<compile_context>
chip_gen: v6e
topology: v6e:2x2x1
jax: 0.10.0
libtpu: 0.0.40
codegen_flags: <defaults>
</compile_context>

<pallas_src>
import functools

import jax
import jax.numpy as jnp
from jax import lax
from jax.experimental import pallas as pl
from jax.experimental.pallas import tpu as pltpu


_LANE = 128                 # TPU lane width
_CHUNK_OUT = 3 * _LANE      # output lanes produced per 128 spatial locations
_MAX_BLOCK_COLS = 32 * _LANE  # cap the per-step static matmul unroll at 32


def _divmod_by_const(x, divisor):
    """Exact (x // divisor, x % divisor) for non-negative int32 `x` and a static
    positive `divisor`, using only ops guaranteed to lower on the TPU VPU
    (no vector integer division).  Non-power-of-two path assumes x < 2**24."""
    if divisor == 1:
        return x, jnp.zeros_like(x)
    if divisor & (divisor - 1) == 0:  # power of two -> shift / mask
        shift = divisor.bit_length() - 1
        return jnp.right_shift(x, shift), jnp.bitwise_and(x, divisor - 1)
    # Float-reciprocal estimate + one exact int32 correction step.
    q = (x.astype(jnp.float32) * (1.0 / float(divisor))).astype(jnp.int32)
    r = x - q * divisor
    q = jnp.where(r < 0, q - 1, jnp.where(r >= divisor, q + 1, q))
    r = jnp.where(r < 0, r + divisor, jnp.where(r >= divisor, r - divisor, r))
    return q, r


def _interleave_perm():
    """Static (384, 384) 0/1 matrix P so that, for x = concat([p0, p1, p2], axis=1)
    with each plane 128 lanes wide:  (x @ P)[:, 3*s + c] == p_c[:, s]."""
    i = jnp.arange(_CHUNK_OUT, dtype=jnp.int32)[:, None]   # source column 128*c + s
    j = jnp.arange(_CHUNK_OUT, dtype=jnp.int32)[None, :]   # destination column 3*s + c
    src_c, src_s = i // _LANE, i % _LANE
    dst_c, dst_s = j % 3, j // 3
    return ((src_c == dst_c) & (src_s == dst_s)).astype(jnp.float32)


def _st_grid_kernel(flow_ref, perm_ref, out_ref, *, dims, block_rows, block_cols):
    """One (batch, D-tile, HW-tile) block.

    flow_ref : VMEM [1, 3, BR, CW]   flow (all three channels), any float dtype
    perm_ref : VMEM [384, 384] f32   static interleave permutation
    out_ref  : VMEM [1, BR, CW*3] f32 channel-last normalized coords
    """
    D, H, W = dims
    HW = H * W
    d0 = pl.program_id(1) * block_rows      # first depth slice of this block
    s0 = pl.program_id(2) * block_cols      # first flattened (h, w) index

    # In-kernel identity grid (no HBM traffic for it), shared by all 3 channels.
    r = lax.broadcasted_iota(jnp.int32, (block_rows, block_cols), 0)
    col = lax.broadcasted_iota(jnp.int32, (block_rows, block_cols), 1)
    d = r + d0
    s = col + s0
    h, w = _divmod_by_const(s, W)

    # 2 * (x / (size - 1) - 0.5) == x * (2 / (size - 1)) - 1; scales folded at
    # trace time.  size == 1 -> scale 0 (output -1) instead of PyTorch's inf/nan.
    sd = 2.0 / (D - 1) if D > 1 else 0.0
    sh = 2.0 / (H - 1) if H > 1 else 0.0
    sw = 2.0 / (W - 1) if W > 1 else 0.0

    fd = flow_ref[0, 0].astype(jnp.float32)
    fh = flow_ref[0, 1].astype(jnp.float32)
    fw = flow_ref[0, 2].astype(jnp.float32)

    # Mask lanes past the real spatial extent (ragged HW tiles): uninitialized
    # VMEM could hold inf/nan, which would otherwise leak into valid outputs
    # through the zero-weighted terms of the permutation matmul below.
    valid = s < HW
    pw = jnp.where(valid, (w.astype(jnp.float32) + fw) * sw - 1.0, 0.0)
    ph = jnp.where(valid, (h.astype(jnp.float32) + fh) * sh - 1.0, 0.0)
    pd = jnp.where(valid, (d.astype(jnp.float32) + fd) * sd - 1.0, 0.0)

    perm = perm_ref[...]
    # Channel-last interleave on the MXU, 128 spatial locations per matmul:
    #   out[:, 3*s + (0, 1, 2)] = (pw, ph, pd)[:, s]
    # The MXU work (~768 f32-equivalent flops/elem) stays hidden under the DMA
    # on v5e/v6e and roughly balances it on v7x — far cheaper than the removed
    # standalone XLA transpose.
    for k in range(block_cols // _LANE):
        lo = k * _LANE
        x = jnp.concatenate(
            [pw[:, lo:lo + _LANE], ph[:, lo:lo + _LANE], pd[:, lo:lo + _LANE]],
            axis=1)                                           # (BR, 384)
        y = jnp.dot(x, perm, preferred_element_type=jnp.float32)
        out_ref[0, :, k * _CHUNK_OUT:(k + 1) * _CHUNK_OUT] = y


def spatial_transformer_grid(flow, *, target_block_elems=256 * 1024):
    """flow: float[N, 3, D, H, W] -> f32[N, D, H, W, 3] (channels reversed, normalized)."""
    N, C, D, H, W = flow.shape
    assert C == 3, "3-D spatial transformer expects 3 flow channels"
    HW = H * W
    assert HW >= _LANE, "H*W must be at least 128 for the lane-tiled fused path"

    # Tile sizes: full D (or 256-row tiles) x a 128-multiple lane tile over H*W,
    # sized so one output block is ~3 MiB; double-buffered in+out + the 576 KiB
    # permutation stays well inside 32 MiB scoped VMEM on every generation.
    block_rows = D if D <= 256 else 256
    budget_cols = max(_LANE, (target_block_elems // block_rows) // _LANE * _LANE)
    hw_full_tiles = max(_LANE, (HW // _LANE) * _LANE)     # keep block <= array dim
    block_cols = min(budget_cols, _MAX_BLOCK_COLS, hw_full_tiles)
    num_row_tiles = pl.cdiv(D, block_rows)
    num_col_tiles = pl.cdiv(HW, block_cols)
    assert HW + block_cols < (1 << 24), "H*W too large for the float-based lane divmod"

    flow2 = flow.reshape(N, 3, D, HW)      # free, contiguous reshape
    perm = _interleave_perm()

    kernel = functools.partial(_st_grid_kernel, dims=(D, H, W),
                               block_rows=block_rows, block_cols=block_cols)

    out_bytes = N * D * HW * 3 * 4
    cost = pl.CostEstimate(
        flops=2 * _CHUNK_OUT * N * D * HW * 3,             # interleave matmuls
        transcendentals=0,
        bytes_accessed=flow2.size * flow2.dtype.itemsize + out_bytes + perm.size * 4,
    )

    out_flat = pl.pallas_call(
        kernel,
        out_shape=jax.ShapeDtypeStruct((N, D, HW * 3), jnp.float32),
        grid=(N, num_row_tiles, num_col_tiles),
        in_specs=[
            pl.BlockSpec((1, 3, block_rows, block_cols), lambda n, r, c: (n, 0, r, c)),
            # Constant block index -> DMA'd once, reused across all grid steps.
            pl.BlockSpec((_CHUNK_OUT, _CHUNK_OUT), lambda n, r, c: (0, 0)),
        ],
        out_specs=pl.BlockSpec((1, block_rows, block_cols * 3),
                               lambda n, r, c: (n, r, c)),
        compiler_params=pltpu.CompilerParams(
            # Every block writes a disjoint output tile -> fully parallel grid
            # (v7x can shard the N * row * col iteration space across its 2 TCs).
            dimension_semantics=("parallel", "parallel", "parallel"),
            vmem_limit_bytes=32 * 1024 * 1024,
        ),
        cost_estimate=cost,
    )(flow2, perm)

    # Free reshape: the kernel already wrote the (..., H, W, 3)-contiguous layout.
    return out_flat.reshape(N, D, H, W, 3)


def _reference(flow):
    """Pure-JAX reference mirroring the PyTorch forward."""
    N, C, D, H, W = flow.shape
    size = (D, H, W)
    vectors = [jnp.arange(s, dtype=jnp.float32) for s in size]
    grid = jnp.stack(jnp.meshgrid(*vectors, indexing="ij"))[None]
    new_locs = grid + flow.astype(jnp.float32)
    chans = [2.0 * (new_locs[:, i] / (size[i] - 1) - 0.5) for i in range(3)]
    new_locs = jnp.stack(chans, axis=1)
    new_locs = jnp.transpose(new_locs, (0, 2, 3, 4, 1))
    return new_locs[..., ::-1]


if __name__ == "__main__":
    key = jax.random.PRNGKey(0)
    N, D, H, W = 2, 8, 16, 16
    flow = jax.random.normal(key, (N, 3, D, H, W), dtype=jnp.float32) * 2.0

    out = jax.block_until_ready(spatial_transformer_grid(flow))
    ref = _reference(flow)

    assert out.shape == (N, D, H, W, 3), out.shape
    assert bool(jnp.allclose(out, ref, atol=1e-5, rtol=1e-5)), "mismatch vs reference"
    print("KERNEL_OK")
</pallas_src>

<mosaic_0001>
module attributes {stable_mosaic.version = 11 : i64} {
  func.func @_st_grid_kernel(%arg0: i32, %arg1: i32, %arg2: i32, %arg3: memref<1x3x8x256xf32, #tpu.memory_space<vmem>>, %arg4: memref<384x384xf32, #tpu.memory_space<vmem>>, %arg5: memref<1x8x768xf32, #tpu.memory_space<vmem>>) attributes {dimension_semantics = [#tpu.dimension_semantics<parallel>, #tpu.dimension_semantics<parallel>, #tpu.dimension_semantics<parallel>], iteration_bounds = array<i64: 2, 1, 1>, scalar_prefetch = 0 : i64, scratch_operands = 0 : i64, tpu.core_type = #tpu.core_type<tc>, window_params = [{transform_indices = @transform_0, window_bounds = array<i64: 1, 3, 8, 256>}, {pipeline_mode = #tpu.pipeline_mode<synchronous>, transform_indices = @transform_1, window_bounds = array<i64: 384, 384>}, {transform_indices = @transform_2, window_bounds = array<i64: 1, 8, 768>}]} {
    %c8_i32 = arith.constant 8 : i32
    %0 = arith.muli %arg1, %c8_i32 : i32
    %c256_i32 = arith.constant 256 : i32
    %1 = arith.muli %arg2, %c256_i32 : i32
    %2 = tpu.iota {dimensions = array<i32: 0>} : vector<8x256xi32>
    %3 = tpu.iota {dimensions = array<i32: 1>} : vector<8x256xi32>
    %4 = vector.broadcast %0 : i32 to vector<8x256xi32>
    %5 = arith.addi %2, %4 : vector<8x256xi32>
    %6 = vector.broadcast %1 : i32 to vector<8x256xi32>
    %7 = arith.addi %3, %6 : vector<8x256xi32>
    %c4_i32 = arith.constant 4 : i32
    %8 = vector.broadcast %c4_i32 : i32 to vector<8x256xi32>
    %9 = arith.shrsi %7, %8 : vector<8x256xi32>
    %c15_i32 = arith.constant 15 : i32
    %10 = vector.broadcast %c15_i32 : i32 to vector<8x256xi32>
    %11 = arith.andi %7, %10 : vector<8x256xi32>
    %c0 = arith.constant 0 : index
    %c0_0 = arith.constant 0 : index
    %c0_1 = arith.constant 0 : index
    %c0_2 = arith.constant 0 : index
    %12 = vector.load %arg3[%c0, %c0_0, %c0_1, %c0_2] : memref<1x3x8x256xf32, #tpu.memory_space<vmem>>, vector<1x1x8x256xf32>
    %13 = vector.shape_cast %12 : vector<1x1x8x256xf32> to vector<8x256xf32>
    %c0_3 = arith.constant 0 : index
    %c1 = arith.constant 1 : index
    %c0_4 = arith.constant 0 : index
    %c0_5 = arith.constant 0 : index
    %14 = vector.load %arg3[%c0_3, %c1, %c0_4, %c0_5] : memref<1x3x8x256xf32, #tpu.memory_space<vmem>>, vector<1x1x8x256xf32>
    %15 = vector.shape_cast %14 : vector<1x1x8x256xf32> to vector<8x256xf32>
    %c0_6 = arith.constant 0 : index
    %c2 = arith.constant 2 : index
    %c0_7 = arith.constant 0 : index
    %c0_8 = arith.constant 0 : index
    %16 = vector.load %arg3[%c0_6, %c2, %c0_7, %c0_8] : memref<1x3x8x256xf32, #tpu.memory_space<vmem>>, vector<1x1x8x256xf32>
    %17 = vector.shape_cast %16 : vector<1x1x8x256xf32> to vector<8x256xf32>
    %c256_i32_9 = arith.constant 256 : i32
    %18 = vector.broadcast %c256_i32_9 : i32 to vector<8x256xi32>
    %19 = arith.cmpi slt, %7, %18 : vector<8x256xi32>
    %20 = arith.sitofp %11 : vector<8x256xi32> to vector<8x256xf32>
    %21 = arith.addf %20, %17 : vector<8x256xf32>
    %cst = arith.constant 0.13333334 : f32
    %22 = vector.broadcast %cst : f32 to vector<8x256xf32>
    %23 = arith.mulf %21, %22 : vector<8x256xf32>
    %cst_10 = arith.constant 1.000000e+00 : f32
    %24 = vector.broadcast %cst_10 : f32 to vector<8x256xf32>
    %25 = arith.subf %23, %24 : vector<8x256xf32>
    %cst_11 = arith.constant 0.000000e+00 : f32
    %26 = vector.broadcast %cst_11 : f32 to vector<8x256xf32>
    %27 = arith.select %19, %25, %26 : vector<8x256xi1>, vector<8x256xf32>
    %28 = arith.sitofp %9 : vector<8x256xi32> to vector<8x256xf32>
    %29 = arith.addf %28, %15 : vector<8x256xf32>
    %cst_12 = arith.constant 0.13333334 : f32
    %30 = vector.broadcast %cst_12 : f32 to vector<8x256xf32>
    %31 = arith.mulf %29, %30 : vector<8x256xf32>
    %cst_13 = arith.constant 1.000000e+00 : f32
    %32 = vector.broadcast %cst_13 : f32 to vector<8x256xf32>
    %33 = arith.subf %31, %32 : vector<8x256xf32>
    %cst_14 = arith.constant 0.000000e+00 : f32
    %34 = vector.broadcast %cst_14 : f32 to vector<8x256xf32>
    %35 = arith.select %19, %33, %34 : vector<8x256xi1>, vector<8x256xf32>
    %36 = arith.sitofp %5 : vector<8x256xi32> to vector<8x256xf32>
    %37 = arith.addf %36, %13 : vector<8x256xf32>
    %cst_15 = arith.constant 0.285714298 : f32
    %38 = vector.broadcast %cst_15 : f32 to vector<8x256xf32>
    %39 = arith.mulf %37, %38 : vector<8x256xf32>
    %cst_16 = arith.constant 1.000000e+00 : f32
    %40 = vector.broadcast %cst_16 : f32 to vector<8x256xf32>
    %41 = arith.subf %39, %40 : vector<8x256xf32>
    %cst_17 = arith.constant 0.000000e+00 : f32
    %42 = vector.broadcast %cst_17 : f32 to vector<8x256xf32>
    %43 = arith.select %19, %41, %42 : vector<8x256xi1>, vector<8x256xf32>
    %c0_18 = arith.constant 0 : index
    %c0_19 = arith.constant 0 : index
    %44 = vector.load %arg4[%c0_18, %c0_19] : memref<384x384xf32, #tpu.memory_space<vmem>>, vector<384x384xf32>
    %45 = vector.extract_strided_slice %27 {offsets = [0, 0], sizes = [8, 128], strides = [1, 1]} : vector<8x256xf32> to vector<8x128xf32>
    %46 = vector.extract_strided_slice %35 {offsets = [0, 0], sizes = [8, 128], strides = [1, 1]} : vector<8x256xf32> to vector<8x128xf32>
    %47 = vector.extract_strided_slice %43 {offsets = [0, 0], sizes = [8, 128], strides = [1, 1]} : vector<8x256xf32> to vector<8x128xf32>
    %48 = tpu.concatenate %45, %46, %47 in 1 : vector<8x128xf32>, vector<8x128xf32>, vector<8x128xf32> -> vector<8x384xf32>
    %cst_20 = arith.constant dense<0.000000e+00> : vector<8x384xf32>
    %49 = tpu.matmul %48, %44, %cst_20 {dimension_numbers = #tpu.dot_dimension_numbers<[1], [0], [0], [1], [0, 0, 1, 1], [], []>} : vector<8x384xf32>, vector<384x384xf32>, vector<8x384xf32> -> vector<8x384xf32>
    %c0_21 = arith.constant 0 : index
    %c0_22 = arith.constant 0 : index
    %c0_23 = arith.constant 0 : index
    %50 = vector.load %arg5[%c0_21, %c0_22, %c0_23] : memref<1x8x768xf32, #tpu.memory_space<vmem>>, vector<1x8x384xf32>
    %51 = vector.shape_cast %50 : vector<1x8x384xf32> to vector<8x384xf32>
    %52 = vector.shape_cast %49 : vector<8x384xf32> to vector<1x8x384xf32>
    tpu.vector_store %arg5[%c0_21, %c0_22, %c0_23], %52 {strides = array<i32>} : memref<1x8x768xf32, #tpu.memory_space<vmem>>, vector<1x8x384xf32>,
    %53 = vector.extract_strided_slice %27 {offsets = [0, 128], sizes = [8, 128], strides = [1, 1]} : vector<8x256xf32> to vector<8x128xf32>
    %54 = vector.extract_strided_slice %35 {offsets = [0, 128], sizes = [8, 128], strides = [1, 1]} : vector<8x256xf32> to vector<8x128xf32>
    %55 = vector.extract_strided_slice %43 {offsets = [0, 128], sizes = [8, 128], strides = [1, 1]} : vector<8x256xf32> to vector<8x128xf32>
    %56 = tpu.concatenate %53, %54, %55 in 1 : vector<8x128xf32>, vector<8x128xf32>, vector<8x128xf32> -> vector<8x384xf32>
    %cst_24 = arith.constant dense<0.000000e+00> : vector<8x384xf32>
    %57 = tpu.matmul %56, %44, %cst_24 {dimension_numbers = #tpu.dot_dimension_numbers<[1], [0], [0], [1], [0, 0, 1, 1], [], []>} : vector<8x384xf32>, vector<384x384xf32>, vector<8x384xf32> -> vector<8x384xf32>
    %c0_25 = arith.constant 0 : index
    %c0_26 = arith.constant 0 : index
    %c384 = arith.constant 384 : index
    %58 = vector.load %arg5[%c0_25, %c0_26, %c384] : memref<1x8x768xf32, #tpu.memory_space<vmem>>, vector<1x8x384xf32>
    %59 = vector.shape_cast %58 : vector<1x8x384xf32> to vector<8x384xf32>
    %60 = vector.shape_cast %57 : vector<8x384xf32> to vector<1x8x384xf32>
    tpu.vector_store %arg5[%c0_25, %c0_26, %c384], %60 {strides = array<i32>} : memref<1x8x768xf32, #tpu.memory_space<vmem>>, vector<1x8x384xf32>,
    return
  }
  func.func @transform_0(%arg0: i32, %arg1: i32, %arg2: i32) -> (i32, i32, i32, i32) {
    %c0_i32 = arith.constant 0 : i32
    %c0_i32_0 = arith.constant 0 : i32
    return %arg0, %c0_i32, %arg1, %arg2 : i32, i32, i32, i32
  }
  func.func @transform_1(%arg0: i32, %arg1: i32, %arg2: i32) -> (i32, i32) {
    %c0_i32 = arith.constant 0 : i32
    %c0_i32_0 = arith.constant 0 : i32
    %c0_i32_1 = arith.constant 0 : i32
    return %c0_i32, %c0_i32_0 : i32, i32
  }
  func.func @transform_2(%arg0: i32, %arg1: i32, %arg2: i32) -> (i32, i32, i32) {
    %c0_i32 = arith.constant 0 : i32
    return %arg0, %arg1, %arg2 : i32, i32, i32
  }
}

</mosaic_0001>

<bundles_post_ra>
// kernel: tpu_custom_call.1
= control target key start
LH: loop header
LB: loop body
LE: loop exit
PB: predicated region body
PF: predicated region fallthrough
CT: control target
= control target key end

     0   :  { %7 = vsyncpa [#allocation3], 0  ;;  %s2358_s0 = inlined_call_operand.hbm [shape: f32[2,3,8,256], index: 0, kind: input, shape index: {}]   ;;  %s2359_s1 = inlined_call_operand.hbm [shape: f32[384,384], index: 1, kind: input, shape index: {}]   ;;  %s2360_s2 = inlined_call_operand.hbm [shape: f32[2,8,768], index: 2, kind: output, shape index: {}]  }
   0x1   :  { %9 = vsyncpa [#allocation3 + $0x1], 0 }
   0x2   :  { %10 = vsyncpa [#allocation6], 0 }
   0x3   :  { %11 = vsyncpa [#allocation4], 0 }
   0x4   :  { %13 = vsyncpa [#allocation4 + $0x1], 0  ;;  %s1541_s9 = smov 0   ;;  %s1543_s10 = smov 0  }
   0x5   :  { %s1545_s11 = smov 0   ;;  %s1547_s12 = smov 0  }
   0x6   :  { %s1549_s13 = smov 0   ;;  %s1551_s14 = smov 0  }
   0x7 LB: > { %s1099_s15 = sadd.s32 4294967295, %s1515_s14   ;;  %s1100_s16 = sadd.s32 4294967294, %s1515_s14   ;;  %s1515_s14 = sphi %s1551_s14, %s19_s14   ;;  %s1511_s13 = sphi %s1549_s13, %s2602_s13   ;;  %s1507_s12 = sphi %s1547_s12, %s2601_s12   ;;  %s1503_s11 = sphi %s1545_s11, %s2600_s11   ;;  %s1499_s10 = sphi %s1543_s10, %s2599_s10   ;;  %s1495_s9 = sphi %s1541_s9, %s2598_s9  }
   0x8   : > { %p62_p0 = scmp.ne.s32.totalorder %s1499_s10, %s1495_s9  ;;  %p1575_p1 = scmp.eq.s32.totalorder %s1099_s15, 0 }
   0x9   : > { %p1579_p2 = scmp.eq.s32.totalorder %s1099_s15, 1  ;;  %p117_p3 = scmp.eq.s32.totalorder %s1100_s16, 1 }
   0xa   : > { %p1585_p4 = por %p1575_p1, %p62_p0  ;;  %p1101_p5 = scmp.ge.s32.totalorder %s1515_s14, 1 }
   0xb   : > { %p1590_p6 = por %p117_p3, %p62_p0  ;;  %p124_p7 = scmp.lt.s32.totalorder %s1515_s14, 3 }
   0xc   : > { %s2441_s19 = scalar_select %p1585_p4, 1, 0 }
   0xd   : > { %s2442_s20 = scalar_select %p1590_p6, 1, 0 }
   0xe   : > { %p1595_p8 = pnand %p1101_p5, %p124_p7  ;;  %s1517_s22 = smov [#allocation5]  }
   0xf   : > { %s136_s23 = sshll.u32 %s1517_s22, 4  ;;  %p1103_p10 = scmp.ge.s32.totalorder %s1515_s14, 2  ;;  %s137_s23 = int_to_ptr.vmem [resolvable:$true] %s136_s23 }
  0x10   : > { %p1306_p9 = pneg %p1595_p8  ;;  %s38_s25 = sadd.s32 1, %s1511_s13 }
  0x11   : > { %s1388_s26 = scalar_lea.vmem %s137_s23, 18432  ;;  %p1396_p5 = scmp.lt.s32.totalorder %s137_s23, %s137_s23 }
  0x12   : > { %p1604_p11 = pnand %p1306_p9, %p1575_p1  ;;  %p1389_p13 = scmp.ne.s32.totalorder %s137_s23, %s1388_s26 }
  0x13   : > { %p1397_p7 = scmp.lt.s32.totalorder %s1388_s26, %s1388_s26 }
  0x14   : > { %p1379_p12 = pneg %p1604_p11 }
  0x15   : > { %p1398_p6 = por %p1397_p7, %p1396_p5 }
  0x16   : > { %p1391_p0 = pnand %p1389_p13, %p1379_p12 }
  0x18   : > { %p1392_p3 = pneg %p1391_p0 }
  0x1a   : > { %p1399_p4 = pnand %p1398_p6, %p1392_p3 }
  0x1c   : > { %1402 = shalt.err (!%p1399_p4)
}
  0x1d   : > { %s1518_s27 = smov 384   ;;  %s1519_s28 = smov 24  }
  0x1e   : > { %1309 = dma.hbm_to_vmem [thread:$0]  (!%p1604_p11), %s2359_s1, 18432, %s137_s23, [#allocation6], %s1518_s27, %s1518_s27, %s1519_s28  }
  0x1f   : > { %p40_p6 = scmp.ge.s32.totalorder %s38_s25, 2  ;;  %s49_s3 = sadd.s32 1, %s1503_s11 }
  0x20   : > { %p56_p4 = scmp.ne.s32.totalorder %s1503_s11, %s1499_s10  ;;  %p57_p9 = scmp.eq.s32.totalorder %s1515_s14, 0 }
  0x21   : > { %s2604_s25 = smov (%p40_p6, %s38_s25), 0  ;;  %p1319_p0 = scmp.lt.s32.totalorder %s1515_s14, 2 }
  0x22   : > { %p58_p12 = por %p57_p9, %p56_p4  ;;  %p1624_p13 = por %p1579_p2, %p56_p4 }
  0x23   : > { %s42_s5 = ssub.s32 %s1511_s13, %s2604_s25  ;;  %s150_s6 = sand.u32 1, %s1503_s11  }
  0x24   : > { %p47_p3 = scmp.eq.s32.totalorder %s42_s5, 0  ;;  %s1294_s7 = smul.u32 48, %s150_s6 }
  0x25   : > { %s1295_s15 = smul.u32 768, %s1511_s13  ;;  %p1636_p11 = pnand %p1319_p0, %p58_p12 }
  0x26   : > { %s1633_s8 = scalar_select %p47_p3, %s1503_s11, %s49_s3  }
  0x27   : > { %s154_s16 = scalar_lea.vmem [#allocation2], %s1294_s7  ;;  %s164_s26 = scalar_lea.hbm %s2358_s0, %s1295_s15 }
  0x28   : > { %s165_s22 = sshll.u32 %s154_s16, 4  ;;  %s151_s27 = scalar_lea.sflag [#allocation3], %s150_s6  ;;  %s166_s22 = int_to_ptr.vmem [resolvable:$true] %s165_s22 }
  0x29   : > { %p1405_p2 = pneg %p1636_p11  ;;  %s1416_s28 = scalar_lea.vmem %s166_s22, 768 }
  0x2a   : > { %p1417_p5 = scmp.ne.s32.totalorder %s166_s22, %s1416_s28  ;;  %s1520_s29 = smov [#allocation2]  }
  0x2b   : > { %s1421_s30 = sshll.u32 %s1520_s29, 4  ;;  %s1422_s30 = int_to_ptr.vmem [resolvable:$false] %s1421_s30 }
  0x2c   : > { %p1419_p7 = pnand %p1417_p5, %p1405_p2  ;;  %s1423_s3 = scalar_lea.vmem %s1422_s30, 1536 }
  0x2d   : > { %p1424_p4 = scmp.lt.s32.totalorder %s166_s22, %s1422_s30  ;;  %p1425_p9 = scmp.lt.s32.totalorder %s1423_s3, %s1416_s28 }
  0x2e   : > { %p1420_p6 = pneg %p1419_p7 }
  0x2f   : > { %p1426_p12 = por %p1425_p9, %p1424_p4 }
  0x31   : > { %p1427_p0 = pnand %p1426_p12, %p1420_p6 }
  0x33   : > { %1430 = shalt.err (!%p1427_p0)
}
  0x34   : > { %s1521_s5 = smov 256   ;;  %s1522_s7 = smov 16  }
  0x35   : > { %1313 = dma.hbm_to_vmem [thread:$0]  (!%p1636_p11), %s164_s26, 768, %s166_s22, %s151_s27, %s1521_s5, %s1521_s5, %s1522_s7  }
  0x36   : > { %177 = sbr.rel (%p1595_p8) target bundleno = 445 (0x1bd), region = 28 }
  0x3b   : > { %s1650_s6 = sand.u32 1, %s1499_s10   ;;  %p2447_p3 = scmp.ne.s32.totalorder %s2441_s19, 0 }
  0x3c   : > { %s1296_s15 = smul.u32 48, %s1650_s6  ;;  %s180_s16 = scalar_lea.sflag [#allocation3], %s1650_s6 }
  0x3e   : > { %s1656_s24 = scalar_lea.vmem [#allocation2], %s1296_s15 }
  0x3f   : > { %1482 = dma.done.wait (%p2447_p3), %s180_s16, 768  }
  0x40   : > { %1484 = vsyncadd (%p2447_p3), %s180_s16, 4294966528 }
  0x41   : > { %1486 = dma.done.wait (%p1575_p1), [#allocation6], 18432  }
  0x42   : > { %1488 = vsyncadd (%p1575_p1), [#allocation6], 4294948864  ;;  %v2363_v0 = vmov 0.0   ;;  %v1667_v1 = vld [vmem:[#allocation5 + $0x170] sm:$0xff]  ;;  %v1671_v3 = vld [vmem:[#allocation5 + $0x168] sm:$0xff]  ;;  %v2365_v29 = vlaneseq  ;;  %vm1524_vm0 = vmmov 0  }
  0x43   : > { %544 = vmatprep.mubr.f32.mxu1 %v2363_v0  ;;  %v1669_v2 = vld [vmem:[#allocation5 + $0x470] sm:$0xff]  ;;  %409 = vmatprep.subr.mxu0 %v1667_v1  ;;  %v1675_v4 = vld [vmem:[#allocation5 + $0x468] sm:$0xff]  ;;  %v1677_v5 = vld [vmem:[#allocation5 + $0x158] sm:$0xff]  ;;  %s207_s17 = scalar_lea.vmem [#allocation7], %s1296_s15  ;;  %s1297_s19 = smul.u32 768, %s1507_s12 }
  0x44   : > { %480 = vmatprep.subr.mxu1 %v1669_v2  ;;  %v1679_v6 = vld [vmem:[#allocation5 + $0x458] sm:$0xff]  ;;  %410 = vmatpush1.msra.mxu0 %v1671_v3  ;;  %v1683_v7 = vld [vmem:[#allocation5 + $0x150] sm:$0xff]  ;;  %v1687_v9 = vld [vmem:[#allocation5 + $0x140] sm:$0xff]  ;;  %v1770_v38 = vshrl.u32 %v2365_v29, 7  ;;  %s998_s21 = sshll.u32 %s207_s17, 4  ;;  %s980_s26 = scalar_lea.sflag [#allocation4], %s1650_s6  ;;  %s999_s21 = int_to_ptr.vmem [resolvable:$true] %s998_s21 }
  0x45   : > { %481 = vmatpush1.msra.mxu1 %v1675_v4  ;;  %v1685_v8 = vld [vmem:[#allocation5 + $0x450] sm:$0xff]  ;;  %411 = vmatprep.subr.mxu0 %v1677_v5  ;;  %v1691_v10 = vld [vmem:[#allocation5 + $0x440] sm:$0xff]  ;;  %v1693_v11 = vld [vmem:[#allocation5 + $0x138] sm:$0xff]  ;;  %s996_s18 = scalar_lea.hbm %s2360_s2, %s1297_s19  ;;  %s1431_s27 = scalar_lea.vmem %s999_s21, 768 }
  0x46   : > { %482 = vmatprep.subr.mxu1 %v1679_v6  ;;  %v1695_v12 = vld [vmem:[#allocation5 + $0x438] sm:$0xff]  ;;  %412 = vmatpush1.msra.mxu0 %v1683_v7  ;;  %v1699_v13 = vld [vmem:[#allocation5 + $0x128] sm:$0xff]  ;;  %v1705_v15 = vld [vmem:[#allocation5 + $0x120] sm:$0xff]  ;;  %2459 = vst [vmem:[#allocation22_spill] sm:$0xff] %v1770_v38  ;;  %v2362_v47 = vcvt.s32.f32 %v1770_v38  ;;  %p1432_p1 = scmp.ne.s32.totalorder %s999_s21, %s1431_s27  ;;  %s1525_s28 = smov [#allocation7]  }
  0x47   : > { %483 = vmatpush1.msra.mxu1 %v1685_v8  ;;  %v1701_v14 = vld [vmem:[#allocation5 + $0x428] sm:$0xff]  ;;  %413 = vmatprep.subr.mxu0 %v1687_v9  ;;  %v1707_v16 = vld [vmem:[#allocation5 + $0x420] sm:$0xff]  ;;  %v1711_v17 = vld [vmem:[#allocation5 + $0x110] sm:$0xff]  ;;  %s1435_s12 = sshll.u32 %s1525_s28, 4  ;;  %s1436_s12 = int_to_ptr.vmem [resolvable:$false] %s1435_s12 }
  0x48   : > { %484 = vmatprep.subr.mxu1 %v1691_v10  ;;  %2448 = vst [vmem:[#allocation11_spill] sm:$0xff] %v1707_v16  ;;  %414 = vmatpush1.msra.mxu0 %v1693_v11  ;;  %v1713_v18 = vld [vmem:[#allocation5 + $0x410] sm:$0xff]  ;;  %v1717_v19 = vld [vmem:[#allocation5 + $0x108] sm:$0xff]  ;;  %v1723_v21 = vld [vmem:[#allocation5 + $0xf8] sm:$0xff]  ;;  %p1433_p8 = pnand %p1432_p1, %p1624_p13  ;;  %s1437_s29 = scalar_lea.vmem %s1436_s12, 1536 }
  0x49   : > { %485 = vmatpush1.msra.mxu1 %v1695_v12  ;;  %2449 = vst [vmem:[#allocation12_spill] sm:$0xff] %v1713_v18  ;;  %415 = vmatprep.subr.mxu0 %v1699_v13  ;;  %v1719_v20 = vld [vmem:[#allocation5 + $0x408] sm:$0xff]  ;;  %v1725_v22 = vld [vmem:[#allocation5 + $0x3f8] sm:$0xff]  ;;  %v1729_v23 = vld [vmem:[#allocation5 + $0xf0] sm:$0xff]  ;;  %p1438_p2 = scmp.lt.s32.totalorder %s999_s21, %s1436_s12  ;;  %p1439_p5 = scmp.lt.s32.totalorder %s1437_s29, %s1431_s27 }
  0x4a   : > { %486 = vmatprep.subr.mxu1 %v1701_v14  ;;  %2450 = vst [vmem:[#allocation13_spill] sm:$0xff] %v1719_v20  ;;  %416 = vmatpush1.msra.mxu0 %v1705_v15  ;;  %2451 = vst [vmem:[#allocation14_spill] sm:$0xff] %v1725_v22  ;;  %v1731_v24 = vld [vmem:[#allocation5 + $0x3f0] sm:$0xff]  ;;  %v1735_v25 = vld [vmem:[#allocation5 + $0xe0] sm:$0xff]  ;;  %p1434_p11 = pneg %p1433_p8 }
  0x4b   : > { %487 = vmatpush1.msra.mxu1 %v1707_v16  ;;  %417 = vmatprep.subr.mxu0 %v1711_v17  ;;  %2452 = vst [vmem:[#allocation15_spill] sm:$0xff] %v1731_v24  ;;  %v1737_v26 = vld [vmem:[#allocation5 + $0x3e0] sm:$0xff]  ;;  %v1741_v27 = vld [vmem:[#allocation5 + $0xd8] sm:$0xff]  ;;  %v1747_v30 = vld [vmem:[#allocation5 + $0xc8] sm:$0xff]  ;;  %p1440_p7 = por %p1439_p5, %p1438_p2 }
  0x4c   : > { %488 = vmatprep.subr.mxu1 %v1713_v18  ;;  %418 = vmatpush1.msra.mxu0 %v1717_v19  ;;  %2453 = vst [vmem:[#allocation16_spill] sm:$0xff] %v1737_v26  ;;  %v1743_v28 = vld [vmem:[#allocation5 + $0x3d8] sm:$0xff]  ;;  %v1749_v31 = vld [vmem:[#allocation5 + $0x3c8] sm:$0xff]  ;;  %v1753_v32 = vld [vmem:[#allocation5 + $0xc0] sm:$0xff] }
  0x4d   : > { %489 = vmatpush1.msra.mxu1 %v1719_v20  ;;  %419 = vmatprep.subr.mxu0 %v1723_v21  ;;  %2454 = vst [vmem:[#allocation17_spill] sm:$0xff] %v1743_v28  ;;  %2455 = vst [vmem:[#allocation18_spill] sm:$0xff] %v1749_v31  ;;  %v1755_v33 = vld [vmem:[#allocation5 + $0x3c0] sm:$0xff]  ;;  %v1759_v34 = vld [vmem:[#allocation5 + $0xb0] sm:$0xff]  ;;  %p1441_p6 = pnand %p1440_p7, %p1434_p11 }
  0x4e   : > { %490 = vmatprep.subr.mxu1 %v1725_v22  ;;  %420 = vmatpush1.msra.mxu0 %v1729_v23  ;;  %2456 = vst [vmem:[#allocation19_spill] sm:$0xff] %v1755_v33  ;;  %v1761_v35 = vld [vmem:[#allocation5 + $0x3b0] sm:$0xff]  ;;  %v1765_v36 = vld [vmem:[#allocation5 + $0xa8] sm:$0xff]  ;;  %v1774_v39 = vld [vmem:[#allocation5 + $0x98] sm:$0xff] }
  0x4f   : > { %491 = vmatpush1.msra.mxu1 %v1731_v24  ;;  %421 = vmatprep.subr.mxu0 %v1735_v25  ;;  %2457 = vst [vmem:[#allocation20_spill] sm:$0xff] %v1761_v35  ;;  %v1767_v37 = vld [vmem:[#allocation5 + $0x3a8] sm:$0xff]  ;;  %v1776_v40 = vld [vmem:[#allocation5 + $0x398] sm:$0xff]  ;;  %v1780_v41 = vld [vmem:[#allocation5 + $0x90] sm:$0xff] }
  0x50   : > { %492 = vmatprep.subr.mxu1 %v1737_v26  ;;  %422 = vmatpush1.msra.mxu0 %v1741_v27  ;;  %2458 = vst [vmem:[#allocation21_spill] sm:$0xff] %v1767_v37  ;;  %2460 = vst [vmem:[#allocation23_spill] sm:$0xff] %v1776_v40  ;;  %v1782_v42 = vld [vmem:[#allocation5 + $0x390] sm:$0xff]  ;;  %v1786_v43 = vld [vmem:[#allocation5 + $0x80] sm:$0xff] }
  0x51   : > { %493 = vmatpush1.msra.mxu1 %v1743_v28  ;;  %423 = vmatprep.subr.mxu0 %v1747_v30  ;;  %2461 = vst [vmem:[#allocation24_spill] sm:$0xff] %v1782_v42  ;;  %v1788_v44 = vld [vmem:[#allocation5 + $0x380] sm:$0xff]  ;;  %v1792_v45 = vld [vmem:[#allocation5 + $0x78] sm:$0xff]  ;;  %v1799_v48 = vld [vmem:[#allocation5 + $0x68] sm:$0xff]  ;;  %v2489_v28 = vlaneseq }
  0x52   : > { %494 = vmatprep.subr.mxu1 %v1749_v31  ;;  %424 = vmatpush1.msra.mxu0 %v1753_v32  ;;  %2462 = vst [vmem:[#allocation25_spill] sm:$0xff] %v1788_v44  ;;  %v1794_v46 = vld [vmem:[#allocation5 + $0x378] sm:$0xff]  ;;  %v1801_v49 = vld [vmem:[#allocation5 + $0x368] sm:$0xff]  ;;  %v1805_v50 = vld [vmem:[#allocation5 + $0x60] sm:$0xff] }
  0x53   : > { %495 = vmatpush1.msra.mxu1 %v1755_v33  ;;  %425 = vmatprep.subr.mxu0 %v1759_v34  ;;  %2463 = vst [vmem:[#allocation26_spill] sm:$0xff] %v1794_v46  ;;  %2464 = vst [vmem:[#allocation27_spill] sm:$0xff] %v1801_v49  ;;  %v1807_v51 = vld [vmem:[#allocation5 + $0x360] sm:$0xff]  ;;  %v1811_v52 = vld [vmem:[#allocation5 + $0x50] sm:$0xff]  ;;  %v1933_v26 = vand.u32 127, %v2489_v28 }
  0x54   : > { %496 = vmatprep.subr.mxu1 %v1761_v35  ;;  %426 = vmatpush1.msra.mxu0 %v1765_v36  ;;  %2465 = vst [vmem:[#allocation28_spill] sm:$0xff] %v1807_v51  ;;  %v1813_v53 = vld [vmem:[#allocation5 + $0x350] sm:$0xff]  ;;  %v1818_v55 = vld [vmem:[#allocation5 + $0x48] sm:$0xff]  ;;  %v1826_v58 = vld [vmem:[#allocation5 + $0x38] sm:$0xff] }
  0x55   : > { %497 = vmatpush1.msra.mxu1 %v1767_v37  ;;  %427 = vmatprep.subr.mxu0 %v1774_v39  ;;  %2466 = vst [vmem:[#allocation29_spill] sm:$0xff] %v1813_v53  ;;  %v226_v54 = vld [vmem:[%s1656_s24] sm:$0xff]  ;;  %v1820_v56 = vld [vmem:[#allocation5 + $0x348] sm:$0xff]  ;;  %v1828_v59 = vld [vmem:[#allocation5 + $0x338] sm:$0xff] }
  0x56   : > { %498 = vmatprep.subr.mxu1 %v1776_v40  ;;  %428 = vmatpush1.msra.mxu0 %v1780_v41  ;;  %2467 = vst [vmem:[#allocation30_spill] sm:$0xff] %v1820_v56  ;;  %v257_v57 = vadd.f32 %v2362_v47, %v226_v54  ;;  %2468 = vst [vmem:[#allocation31_spill] sm:$0xff] %v1828_v59  ;;  %v1832_v60 = vld [vmem:[#allocation5 + $0x30] sm:$0xff]  ;;  %v1838_v62 = vld [vmem:[#allocation5 + $0x20] sm:$0xff] }
  0x57   : > { %499 = vmatpush1.msra.mxu1 %v1782_v42  ;;  %429 = vmatprep.subr.mxu0 %v1786_v43  ;;  %v1834_v61 = vld [vmem:[#allocation5 + $0x330] sm:$0xff]  ;;  %v1840_v63 = vld [vmem:[#allocation5 + $0x320] sm:$0xff]  ;;  %v1844_v47 = vld [vmem:[#allocation5 + $0x18] sm:$0xff]  ;;  %2490 = vst [vmem:[#allocation52_spill] sm:$0xff] %v1933_v26 }
  0x58   : > { %500 = vmatprep.subr.mxu1 %v1788_v44  ;;  %430 = vmatpush1.msra.mxu0 %v1792_v45  ;;  %2469 = vst [vmem:[#allocation32_spill] sm:$0xff] %v1834_v61  ;;  %2470 = vst [vmem:[#allocation33_spill] sm:$0xff] %v1840_v63  ;;  %v259_v54 = vmul.f32 0.2857143, %v257_v57  ;;  %v1846_v0 = vld [vmem:[#allocation5 + $0x318] sm:$0xff]  ;;  %v1850_v29 = vld [vmem:[#allocation5 + $0x8] sm:$0xff] }
  0x59   : > { %501 = vmatpush1.msra.mxu1 %v1794_v46  ;;  %431 = vmatprep.subr.mxu0 %v1799_v48  ;;  %2471 = vst [vmem:[#allocation34_spill] sm:$0xff] %v1846_v0  ;;  %v1856_v57 = vld [vmem:[#allocation5] sm:$0xff]  ;;  %v1876_v38 = vld [vmem:[#allocation5 + $0x2d8] sm:$0xff]  ;;  %v1900_v42 = vld [vmem:[#allocation5 + $0x2a8] sm:$0xff] }
  0x5a   : > { %502 = vmatprep.subr.mxu1 %v1801_v49  ;;  %432 = vmatpush1.msra.mxu0 %v1805_v50  ;;  %v1870_v49 = vld [vmem:[#allocation5 + $0x2e8] sm:$0xff]  ;;  %v1888_v46 = vld [vmem:[#allocation5 + $0x2c0] sm:$0xff]  ;;  %v1894_v44 = vld [vmem:[#allocation5 + $0x2b8] sm:$0xff] }
  0x5b   : > { %503 = vmatpush1.msra.mxu1 %v1807_v51  ;;  %433 = vmatprep.subr.mxu0 %v1811_v52  ;;  %v1864_v51 = vld [vmem:[#allocation5 + $0x2f8] sm:$0xff]  ;;  %v1904_v40 = vld [vmem:[#allocation5 + $0x2b0] sm:$0xff]  ;;  %v1928_v31 = vld [vmem:[#allocation5 + $0x280] sm:$0xff] }
  0x5c   : > { %504 = vmatprep.subr.mxu1 %v1813_v53  ;;  %434 = vmatpush1.msra.mxu0 %v1818_v55  ;;  %v1858_v53 = vld [vmem:[#allocation5 + $0x300] sm:$0xff]  ;;  %2474 = vst [vmem:[#allocation37_spill] sm:$0xff] %v1864_v51  ;;  %2480 = vst [vmem:[#allocation43_spill] sm:$0xff] %v1904_v40  ;;  %v1910_v37 = vld [vmem:[#allocation5 + $0x130] sm:$0xff] }
  0x5d   : > { %505 = vmatpush1.msra.mxu1 %v1820_v56  ;;  %435 = vmatprep.subr.mxu0 %v1826_v58  ;;  %v1852_v56 = vld [vmem:[#allocation5 + $0x308] sm:$0xff]  ;;  %2473 = vst [vmem:[#allocation36_spill] sm:$0xff] %v1858_v53  ;;  %2481 = vst [vmem:[#allocation44_spill] sm:$0xff] %v1910_v37  ;;  %v1916_v35 = vld [vmem:[#allocation5 + $0x298] sm:$0xff] }
  0x5e   : > { %506 = vmatprep.subr.mxu1 %v1828_v59  ;;  %436 = vmatpush1.msra.mxu0 %v1832_v60  ;;  %2472 = vst [vmem:[#allocation35_spill] sm:$0xff] %v1852_v56  ;;  %v1862_v59 = vld [vmem:[#allocation5 + $0x2f0] sm:$0xff]  ;;  %2483 = vst [vmem:[#allocation46_spill] sm:$0xff] %v1916_v35  ;;  %v1922_v33 = vld [vmem:[#allocation5 + $0x118] sm:$0xff] }
  0x5f   : > { %507 = vmatpush1.msra.mxu1 %v1834_v61  ;;  %437 = vmatprep.subr.mxu0 %v1838_v62  ;;  %v1866_v61 = vadd.f32 -1.0, %v259_v54  ;;  %v1880_v54 = vld [vmem:[#allocation5 + $0x2e0] sm:$0xff]  ;;  %2485 = vst [vmem:[#allocation48_spill] sm:$0xff] %v1922_v33  ;;  %2487 = vst [vmem:[#allocation50_spill] sm:$0xff] %v1928_v31  ;;  %v1945_v22 = vld [vmem:[#allocation5 + $0x258] sm:$0xff] }
  0x60   : > { %508 = vmatprep.subr.mxu1 %v1840_v63  ;;  %438 = vmatpush1.msra.mxu0 %v1844_v47  ;;  %v1874_v63 = vld [vmem:[#allocation5 + $0x178] sm:$0xff]  ;;  %2476 = vst [vmem:[#allocation39_spill] sm:$0xff] %v1880_v54  ;;  %v1939_v24 = vld [vmem:[#allocation5 + $0x260] sm:$0xff]  ;;  %2494 = vst [vmem:[#allocation56_spill] sm:$0xff] %v1945_v22 }
  0x61   : > { %509 = vmatpush1.msra.mxu1 %v1846_v0  ;;  %439 = vmatprep.subr.mxu0 %v1850_v29  ;;  %2475 = vst [vmem:[#allocation38_spill] sm:$0xff] %v1874_v63  ;;  %v1882_v0 = vld [vmem:[#allocation5 + $0x2d0] sm:$0xff]  ;;  %2492 = vst [vmem:[#allocation54_spill] sm:$0xff] %v1939_v24  ;;  %v1949_v28 = vld [vmem:[#allocation5 + $0xe8] sm:$0xff] }
  0x62   : > { %510 = vmatprep.subr.mxu1 %v1852_v56  ;;  %440 = vmatpush1.msra.mxu0 %v1856_v57  ;;  %v1886_v56 = vld [vmem:[#allocation5 + $0x160] sm:$0xff]  ;;  %2495 = vst [vmem:[#allocation57_spill] sm:$0xff] %v1949_v28  ;;  %v1955_v20 = vld [vmem:[#allocation5 + $0x250] sm:$0xff] }
  0x63   : > { %511 = vmatpush1.msra.mxu1 %v1858_v53  ;;  %441 = vmatprep.subr.mxu0 %v1862_v59  ;;  %2477 = vst [vmem:[#allocation40_spill] sm:$0xff] %v1886_v56  ;;  %v1892_v53 = vld [vmem:[#allocation5 + $0x2c8] sm:$0xff]  ;;  %2497 = vst [vmem:[#allocation59_spill] sm:$0xff] %v1955_v20  ;;  %v1109_v16 = vld [vmem:[%s1656_s24 + $0x20] sm:$0xff] }
  0x64   : > { %1120 = vmatprep.subr.mxu1 %v1864_v51  ;;  %442 = vmatpush2.msra.mxu0 %v1870_v49  ;;  %2478 = vst [vmem:[#allocation41_spill] sm:$0xff] %v1892_v53  ;;  %v1898_v51 = vld [vmem:[#allocation5 + $0x148] sm:$0xff] }
  0x65   : > { %545 = vmatmul.mubr.f32.vlgmr.msra.gmra.mxu1 %v1866_v61  ;;  %443 = vmatprep.subr.mxu0 %v1876_v38  ;;  %2479 = vst [vmem:[#allocation42_spill] sm:$0xff] %v1898_v51 }
  0x66   : > { %1121 = vmatpush3.msra.mxu1 %v1874_v63  ;;  %444 = vmatpush2.msra.mxu0 %v1882_v0  ;;  %v1906_v63 = vld [vmem:[#allocation5 + $0x2a0] sm:$0xff] }
  0x67   : > { %1122 = vmatprep.subr.mxu1 %v1880_v54  ;;  %445 = vmatprep.subr.mxu0 %v1888_v46  ;;  %v1912_v54 = vld [vmem:[#allocation5 + $0x290] sm:$0xff] }
  0x68   : > { %1123 = vmatpush3.msra.mxu1 %v1886_v56  ;;  %446 = vmatpush2.msra.mxu0 %v1894_v44  ;;  %2482 = vst [vmem:[#allocation45_spill] sm:$0xff] %v1912_v54  ;;  %v1918_v56 = vld [vmem:[#allocation5 + $0x288] sm:$0xff] }
  0x69   : > { %1124 = vmatprep.subr.mxu1 %v1892_v53  ;;  %447 = vmatprep.subr.mxu0 %v1900_v42  ;;  %2484 = vst [vmem:[#allocation47_spill] sm:$0xff] %v1918_v56  ;;  %v1924_v53 = vld [vmem:[#allocation5 + $0x278] sm:$0xff] }
  0x6a   : > { %1125 = vmatpush3.msra.mxu1 %v1898_v51  ;;  %448 = vmatpush2.msra.mxu0 %v1906_v63  ;;  %2486 = vst [vmem:[#allocation49_spill] sm:$0xff] %v1924_v53  ;;  %v1930_v51 = vld [vmem:[#allocation5 + $0x270] sm:$0xff] }
  0x6b   : > { %1126 = vmatprep.subr.mxu1 %v1904_v40  ;;  %449 = vmatprep.subr.mxu0 %v1912_v54  ;;  %2488 = vst [vmem:[#allocation51_spill] sm:$0xff] %v1930_v51  ;;  %v1937_v40 = vld [vmem:[#allocation5 + $0x100] sm:$0xff] }
  0x6c   : > { %1127 = vmatpush3.msra.mxu1 %v1910_v37  ;;  %450 = vmatpush2.msra.mxu0 %v1918_v56  ;;  %2491 = vst [vmem:[#allocation53_spill] sm:$0xff] %v1937_v40  ;;  %v1943_v37 = vld [vmem:[#allocation5 + $0x268] sm:$0xff]  ;;  %v224_v56 = vand.u32 15, %v1933_v26 }
  0x6d   : > { %1128 = vmatprep.subr.mxu1 %v1916_v35  ;;  %451 = vmatprep.subr.mxu0 %v1924_v53  ;;  %2493 = vst [vmem:[#allocation55_spill] sm:$0xff] %v1943_v37  ;;  %v1951_v35 = vld [vmem:[#allocation5 + $0x248] sm:$0xff]  ;;  %v222_v53 = vshra.s32 %v1933_v26, 4  ;;  %v1107_v26 = vld [vmem:[%s1656_s24 + $0x10] sm:$0xff] }
  0x6e   : > { %1129 = vmatpush3.msra.mxu1 %v1922_v33  ;;  %452 = vmatpush2.msra.mxu0 %v1930_v51  ;;  %2496 = vst [vmem:[#allocation58_spill] sm:$0xff] %v1951_v35  ;;  %v1957_v33 = vld [vmem:[#allocation5 + $0x240] sm:$0xff]  ;;  %v1964_v51 = vld [vmem:[#allocation5 + $0x230] sm:$0xff]  ;;  %v236_v54 = vcvt.s32.f32 %v224_v56 }
  0x6f   : > { %1130 = vmatprep.subr.mxu1 %v1928_v31  ;;  %453 = vmatprep.subr.mxu0 %v1939_v24  ;;  %2498 = vst [vmem:[#allocation60_spill] sm:$0xff] %v1957_v33  ;;  %v1962_v31 = vld [vmem:[#allocation5 + $0xd0] sm:$0xff]  ;;  %2500 = vst [vmem:[#allocation62_spill] sm:$0xff] %v1964_v51  ;;  %v1971_v24 = vld [vmem:[#allocation5 + $0x228] sm:$0xff]  ;;  %v246_v18 = vcvt.s32.f32 %v222_v53 }
  0x70   : > { %1131 = vmatpush3.msra.mxu1 %v1937_v40  ;;  %454 = vmatpush2.msra.mxu0 %v1945_v22  ;;  %2499 = vst [vmem:[#allocation61_spill] sm:$0xff] %v1962_v31  ;;  %v1969_v40 = vld [vmem:[#allocation5 + $0x238] sm:$0xff]  ;;  %2502 = vst [vmem:[#allocation64_spill] sm:$0xff] %v1971_v24  ;;  %v2001_v53 = vld [vmem:[#allocation5 + $0x88] sm:$0xff] }
  0x71   : > { %1132 = vmatprep.subr.mxu1 %v1943_v37  ;;  %455 = vmatprep.subr.mxu0 %v1951_v35  ;;  %2501 = vst [vmem:[#allocation63_spill] sm:$0xff] %v1969_v40  ;;  %v1975_v37 = vld [vmem:[#allocation5 + $0xb8] sm:$0xff]  ;;  %v1983_v35 = vld [vmem:[#allocation5 + $0x210] sm:$0xff]  ;;  %2510 = vst [vmem:[#allocation72_spill] sm:$0xff] %v2001_v53 }
  0x72   : > { %1133 = vmatpush3.msra.mxu1 %v1949_v28  ;;  %456 = vmatpush2.msra.mxu0 %v1957_v33  ;;  %2503 = vst [vmem:[#allocation65_spill] sm:$0xff] %v1975_v37  ;;  %v1977_v22 = vld [vmem:[#allocation5 + $0x218] sm:$0xff]  ;;  %v1981_v28 = vld [vmem:[#allocation5 + $0x220] sm:$0xff]  ;;  %2506 = vst [vmem:[#allocation68_spill] sm:$0xff] %v1983_v35 }
  0x73   : > { %1134 = vmatprep.subr.mxu1 %v1955_v20  ;;  %2504 = vst [vmem:[#allocation66_spill] sm:$0xff] %v1977_v22  ;;  %457 = vmatprep.subr.mxu0 %v1964_v51  ;;  %2505 = vst [vmem:[#allocation67_spill] sm:$0xff] %v1981_v28  ;;  %v1987_v20 = vld [vmem:[#allocation5 + $0xa0] sm:$0xff]  ;;  %v1996_v51 = vld [vmem:[#allocation5 + $0x1f8] sm:$0xff] }
  0x74   : > { %1135 = vmatpush3.msra.mxu1 %v1962_v31  ;;  %458 = vmatpush2.msra.mxu0 %v1971_v24  ;;  %2507 = vst [vmem:[#allocation69_spill] sm:$0xff] %v1987_v20  ;;  %v1989_v33 = vld [vmem:[#allocation5 + $0x200] sm:$0xff]  ;;  %v1994_v31 = vld [vmem:[#allocation5 + $0x208] sm:$0xff]  ;;  %v2007_v56 = vld [vmem:[#allocation5 + $0x1f0] sm:$0xff]  ;;  %v238_v24 = vadd.f32 %v1109_v16, %v236_v54 }
  0x75   : > { %1136 = vmatprep.subr.mxu1 %v1969_v40  ;;  %2508 = vst [vmem:[#allocation70_spill] sm:$0xff] %v1989_v33  ;;  %459 = vmatprep.subr.mxu0 %v1977_v22  ;;  %2509 = vst [vmem:[#allocation71_spill] sm:$0xff] %v1994_v31  ;;  %v2003_v40 = vld [vmem:[#allocation5 + $0x1e8] sm:$0xff]  ;;  %v248_v22 = vadd.f32 %v1107_v26, %v246_v18  ;;  %v2025_v18 = vld [vmem:[#allocation5 + $0x58] sm:$0xff] }
  0x76   : > { %1137 = vmatpush3.msra.mxu1 %v1975_v37  ;;  %460 = vmatpush2.msra.mxu0 %v1983_v35  ;;  %2511 = vst [vmem:[#allocation73_spill] sm:$0xff] %v2007_v56  ;;  %v2009_v37 = vld [vmem:[#allocation5 + $0x1e0] sm:$0xff]  ;;  %v2015_v35 = vld [vmem:[#allocation5 + $0x1d0] sm:$0xff]  ;;  %2516 = vst [vmem:[#allocation78_spill] sm:$0xff] %v2025_v18 }
  0x77   : > { %1138 = vmatprep.subr.mxu1 %v1981_v28  ;;  %461 = vmatprep.subr.mxu0 %v1989_v33  ;;  %2512 = vst [vmem:[#allocation74_spill] sm:$0xff] %v2009_v37  ;;  %v2013_v28 = vld [vmem:[#allocation5 + $0x70] sm:$0xff]  ;;  %2514 = vst [vmem:[#allocation76_spill] sm:$0xff] %v2015_v35  ;;  %v2021_v33 = vld [vmem:[#allocation5 + $0x1c8] sm:$0xff] }
  0x78   : > { %1139 = vmatpush3.msra.mxu1 %v1987_v20  ;;  %462 = vmatpush2.msra.mxu0 %v1996_v51  ;;  %2513 = vst [vmem:[#allocation75_spill] sm:$0xff] %v2013_v28  ;;  %v2019_v20 = vld [vmem:[#allocation5 + $0x1d8] sm:$0xff]  ;;  %v2031_v16 = vld [vmem:[#allocation5 + $0x1c0] sm:$0xff]  ;;  %v2033_v54 = vld [vmem:[#allocation5 + $0x1b0] sm:$0xff] }
  0x79   : > { %1140 = vmatprep.subr.mxu1 %v1994_v31  ;;  %463 = vmatprep.subr.mxu0 %v2003_v40  ;;  %2515 = vst [vmem:[#allocation77_spill] sm:$0xff] %v2019_v20  ;;  %v2027_v26 = vld [vmem:[#allocation5 + $0x1b8] sm:$0xff]  ;;  %2518 = vst [vmem:[#allocation80_spill] sm:$0xff] %v2031_v16  ;;  %v2039_v31 = vld [vmem:[#allocation5 + $0x1a0] sm:$0xff] }
  0x7a   : > { %1141 = vmatpush3.msra.mxu1 %v2001_v53  ;;  %464 = vmatpush2.msra.mxu0 %v2009_v37  ;;  %2517 = vst [vmem:[#allocation79_spill] sm:$0xff] %v2027_v26  ;;  %2519 = vst [vmem:[#allocation81_spill] sm:$0xff] %v2033_v54  ;;  %v250_v53 = vmul.f32 0.13333334, %v248_v22  ;;  %v240_v37 = vmul.f32 0.13333334, %v238_v24 }
  0x7b   : > { %1142 = vmatprep.subr.mxu1 %v2007_v56  ;;  %465 = vmatprep.subr.mxu0 %v2015_v35  ;;  %v2037_v56 = vld [vmem:[#allocation5 + $0x40] sm:$0xff]  ;;  %v2045_v35 = vld [vmem:[#allocation5 + $0x198] sm:$0xff]  ;;  %v2049_v22 = vld [vmem:[#allocation5 + $0x28] sm:$0xff] }
  0x7c   : > { %1143 = vmatpush3.msra.mxu1 %v2013_v28  ;;  %466 = vmatpush2.msra.mxu0 %v2021_v33  ;;  %2520 = vst [vmem:[#allocation82_spill] sm:$0xff] %v2037_v56  ;;  %v2043_v28 = vld [vmem:[#allocation5 + $0x1a8] sm:$0xff]  ;;  %v2055_v24 = vld [vmem:[#allocation5 + $0x190] sm:$0xff] }
  0x7d   : > { %1144 = vmatprep.subr.mxu1 %v2019_v20  ;;  %467 = vmatprep.subr.mxu0 %v2027_v26  ;;  %v2051_v20 = vld [vmem:[#allocation5 + $0x188] sm:$0xff]  ;;  %2521 = vst [vmem:[#allocation83_spill] sm:$0xff] %v2055_v24  ;;  %v1113_v26 = vadd.f32 -1.0, %v250_v53  ;;  %v2522_v53 = vmov 0.0  }
  0x7e   : > { %1145 = vmatpush3.msra.mxu1 %v2025_v18  ;;  %468 = vmatpush2.msra.mxu0 %v2033_v54  ;;  %v2057_v18 = vld [vmem:[#allocation5 + $0x180] sm:$0xff]  ;;  %v1111_v54 = vadd.f32 -1.0, %v240_v37 }
  0x7f   : > { %1146 = vmatprep.subr.mxu1 %v2031_v16  ;;  %469 = vmatprep.subr.mxu0 %v2039_v31  ;;  %v2061_v16 = vld [vmem:[#allocation5 + $0x10] sm:$0xff]  ;;  %v2072_v37 = vld [vmem:[#allocation5 + $0x460] sm:$0xff] }
  0x80   : > { %1147 = vmatpush3.msra.mxu1 %v2037_v56  ;;  %470 = vmatpush2.msra.mxu0 %v2045_v35  ;;  %v2068_v56 = vld [vmem:[#allocation5 + $0x478] sm:$0xff] }
  0x81   : > { %1148 = vmatprep.subr.mxu1 %v2043_v28  ;;  %471 = vmatprep.subr.mxu0 %v2051_v20 }
  0x82   : > { %1149 = vmatpush3.msra.mxu1 %v2049_v22  ;;  %472 = vmatpush2.msra.mxu0 %v2057_v18 }
  0x83   : > { %1150 = vmatprep.subr.mxu1 %v2055_v24  ;;  %473 = vmatprep.mubr.f32.mxu0 %v1113_v26  ;;  %v2077_v24 = vld [vmem:[#allocation5 + $0x448] sm:$0xff] }
  0x84   : > { %1151 = vmatpush3.msra.mxu1 %v2061_v16  ;;  %474 = vmatmul.mubr.f32.vlgmr.msra.gmra.mxu0 %v1111_v54 }
  0x85   : > { %615 = vmatprep.mubr.f32.mxu1 %v1113_v26  ;;  %1224 = vmatprep.subr.mxu0 %v2522_v53 }
  0x86   : > { %694 = vmatprep.subr.mxu1 %v1667_v1  ;;  %616 = vmatmul.mubr.f32.vlgmr.msra.gmra.mxu1 %v1111_v54  ;;  %v2083_v1 = vld [vmem:[#allocation5 + $0x430] sm:$0xff] }
  0x87   : > { %1225 = vmatpush3.msra.mxu0 %v2068_v56  ;;  %695 = vmatpush1.msra.mxu1 %v1671_v3  ;;  %v2089_v3 = vld [vmem:[#allocation5 + $0x418] sm:$0xff]  ;;  %v2550_v54 = vld [vmem:[#allocation25_spill] sm:$0xff] }
  0x88   : > { %1226 = vmatprep.subr.mxu0 %v2522_v53  ;;  %696 = vmatprep.subr.mxu1 %v1677_v5  ;;  %v2095_v5 = vld [vmem:[#allocation5 + $0x400] sm:$0xff] }
  0x89   : > { %1227 = vmatpush3.msra.mxu0 %v2072_v37  ;;  %697 = vmatpush1.msra.mxu1 %v1683_v7  ;;  %v2101_v7 = vld [vmem:[#allocation5 + $0x3e8] sm:$0xff] }
  0x8a   : > { %1228 = vmatprep.subr.mxu0 %v2522_v53  ;;  %698 = vmatprep.subr.mxu1 %v1687_v9  ;;  %v2107_v9 = vld [vmem:[#allocation5 + $0x3d0] sm:$0xff] }
  0x8b   : > { %1229 = vmatpush3.msra.mxu0 %v2077_v24  ;;  %699 = vmatpush1.msra.mxu1 %v1693_v11  ;;  %v2113_v11 = vld [vmem:[#allocation5 + $0x3b8] sm:$0xff] }
  0x8c   : > { %1230 = vmatprep.subr.mxu0 %v2522_v53  ;;  %700 = vmatprep.subr.mxu1 %v1699_v13  ;;  %v2119_v13 = vld [vmem:[#allocation5 + $0x3a0] sm:$0xff] }
  0x8d   : > { %1231 = vmatpush3.msra.mxu0 %v2083_v1  ;;  %701 = vmatpush1.msra.mxu1 %v1705_v15  ;;  %v2125_v15 = vld [vmem:[#allocation5 + $0x388] sm:$0xff] }
  0x8e   : > { %1232 = vmatprep.subr.mxu0 %v2522_v53  ;;  %702 = vmatprep.subr.mxu1 %v1711_v17  ;;  %v2131_v17 = vld [vmem:[#allocation5 + $0x370] sm:$0xff] }
  0x8f   : > { %1233 = vmatpush3.msra.mxu0 %v2089_v3  ;;  %703 = vmatpush1.msra.mxu1 %v1717_v19  ;;  %v2137_v19 = vld [vmem:[#allocation5 + $0x358] sm:$0xff] }
  0x90   : > { %1234 = vmatprep.subr.mxu0 %v2522_v53  ;;  %704 = vmatprep.subr.mxu1 %v1723_v21  ;;  %v2143_v21 = vld [vmem:[#allocation5 + $0x340] sm:$0xff] }
  0x91   : > { %1235 = vmatpush3.msra.mxu0 %v2095_v5  ;;  %705 = vmatpush1.msra.mxu1 %v1729_v23  ;;  %v2149_v23 = vld [vmem:[#allocation5 + $0x328] sm:$0xff] }
  0x92   : > { %1236 = vmatprep.subr.mxu0 %v2522_v53  ;;  %706 = vmatprep.subr.mxu1 %v1735_v25  ;;  %v2155_v25 = vld [vmem:[#allocation5 + $0x310] sm:$0xff] }
  0x93   : > { %1237 = vmatpush3.msra.mxu0 %v2101_v7  ;;  %707 = vmatpush1.msra.mxu1 %v1741_v27  ;;  %v2527_v27 = vld [vmem:[#allocation47_spill] sm:$0xff] }
  0x94   : > { %1238 = vmatprep.subr.mxu0 %v2522_v53  ;;  %708 = vmatprep.subr.mxu1 %v1747_v30  ;;  %v2531_v30 = vld [vmem:[#allocation51_spill] sm:$0xff] }
  0x95   : > { %1239 = vmatpush3.msra.mxu0 %v2107_v9  ;;  %709 = vmatpush1.msra.mxu1 %v1753_v32  ;;  %v2533_v32 = vld [vmem:[#allocation54_spill] sm:$0xff] }
  0x96   : > { %1240 = vmatprep.subr.mxu0 %v2522_v53  ;;  %710 = vmatprep.subr.mxu1 %v1759_v34 }
  0x97   : > { %1241 = vmatpush3.msra.mxu0 %v2113_v11  ;;  %711 = vmatpush1.msra.mxu1 %v1765_v36  ;;  %v2534_v36 = vld [vmem:[#allocation16_spill] sm:$0xff] }
  0x98   : > { %1242 = vmatprep.subr.mxu0 %v2522_v53  ;;  %712 = vmatprep.subr.mxu1 %v1774_v39 }
  0x99   : > { %1243 = vmatpush3.msra.mxu0 %v2119_v13  ;;  %713 = vmatpush1.msra.mxu1 %v1780_v41  ;;  %v2536_v41 = vld [vmem:[#allocation17_spill] sm:$0xff] }
  0x9a   : > { %1244 = vmatprep.subr.mxu0 %v2522_v53  ;;  %714 = vmatprep.subr.mxu1 %v1786_v43  ;;  %v2538_v43 = vld [vmem:[#allocation18_spill] sm:$0xff] }
  0x9b   : > { %1245 = vmatpush3.msra.mxu0 %v2125_v15  ;;  %715 = vmatpush1.msra.mxu1 %v1792_v45  ;;  %v2540_v45 = vld [vmem:[#allocation19_spill] sm:$0xff] }
  0x9c   : > { %1246 = vmatprep.subr.mxu0 %v2522_v53  ;;  %716 = vmatprep.subr.mxu1 %v1799_v48  ;;  %v2542_v48 = vld [vmem:[#allocation20_spill] sm:$0xff] }
  0x9d   : > { %1247 = vmatpush3.msra.mxu0 %v2131_v17  ;;  %717 = vmatpush1.msra.mxu1 %v1805_v50  ;;  %v1108_v50 = vld [vmem:[%s1656_s24 + $0x18] sm:$0xff] }
  0x9e   : > { %1248 = vmatprep.subr.mxu0 %v2522_v53  ;;  %718 = vmatprep.subr.mxu1 %v1811_v52 }
  0x9f   : > { %1249 = vmatpush3.msra.mxu0 %v2137_v19  ;;  %719 = vmatpush1.msra.mxu1 %v1818_v55  ;;  %v2544_v55 = vld [vmem:[#allocation21_spill] sm:$0xff] }
  0xa0   : > { %1250 = vmatprep.subr.mxu0 %v2522_v53  ;;  %720 = vmatprep.subr.mxu1 %v1826_v58  ;;  %v2545_v58 = vld [vmem:[#allocation66_spill] sm:$0xff] }
  0xa1   : > { %1251 = vmatpush3.msra.mxu0 %v2143_v21  ;;  %721 = vmatpush1.msra.mxu1 %v1832_v60  ;;  %v2546_v60 = vld [vmem:[#allocation23_spill] sm:$0xff] }
  0xa2   : > { %1252 = vmatprep.subr.mxu0 %v2522_v53  ;;  %722 = vmatprep.subr.mxu1 %v1838_v62  ;;  %v227_v62 = vld [vmem:[%s1656_s24 + $0x8] sm:$0xff] }
  0xa3   : > { %1253 = vmatpush3.msra.mxu0 %v2149_v23  ;;  %723 = vmatpush1.msra.mxu1 %v1844_v47 }
  0xa4   : > { %1254 = vmatprep.subr.mxu0 %v2522_v53  ;;  %724 = vmatprep.subr.mxu1 %v1850_v29  ;;  %v2529_v29 = vld [vmem:[#allocation49_spill] sm:$0xff] }
  0xa5   : > { %1255 = vmatpush3.msra.mxu0 %v2155_v25  ;;  %1256 = vmatprep.mubr.msk.f32.mxu0 %vm1524_vm0, %v2522_v53 }
  0xa6   : > { %725 = vmatpush1.msra.mxu1 %v1856_v57  ;;  %1257 = vmatmul.mubr.f32.vlgmr.msra.gmra.mxu0 %v1866_v61  ;;  %v2547_v61 = vld [vmem:[#allocation68_spill] sm:$0xff]  ;;  %v2549_v57 = vld [vmem:[#allocation70_spill] sm:$0xff] }
  0xa7   : > { %726 = vmatprep.subr.mxu1 %v1862_v59  ;;  %765 = vmatprep.subr.mxu0 %v1669_v2  ;;  %v2523_v2 = vld [vmem:[#allocation11_spill] sm:$0xff]  ;;  %v1110_v59 = vld [vmem:[%s1656_s24 + $0x28] sm:$0xff] }
  0xa8   : > { %727 = vmatpush2.msra.mxu1 %v1870_v49  ;;  %766 = vmatpush1.msra.mxu0 %v1675_v4  ;;  %v2524_v4 = vld [vmem:[#allocation45_spill] sm:$0xff]  ;;  %v2543_v49 = vld [vmem:[#allocation64_spill] sm:$0xff] }
  0xa9   : > { %728 = vmatprep.subr.mxu1 %v1876_v38  ;;  %767 = vmatprep.subr.mxu0 %v1679_v6  ;;  %v2535_v38 = vld [vmem:[#allocation56_spill] sm:$0xff] }
  0xaa   : > { %729 = vmatpush2.msra.mxu1 %v1882_v0  ;;  %768 = vmatpush1.msra.mxu0 %v1685_v8  ;;  %v2525_v0 = vld [vmem:[#allocation52_spill] sm:$0xff] }
  0xab   : > { %730 = vmatprep.subr.mxu1 %v1888_v46  ;;  %769 = vmatprep.subr.mxu0 %v1691_v10  ;;  %v216_v6 = vadd.s32 128, %v2525_v0  ;;  %v2526_v8 = vld [vmem:[#allocation12_spill] sm:$0xff]  ;;  %v2528_v10 = vld [vmem:[#allocation13_spill] sm:$0xff]  ;;  %v2541_v46 = vld [vmem:[#allocation62_spill] sm:$0xff] }
  0xac   : > { %731 = vmatpush2.msra.mxu1 %v1894_v44  ;;  %770 = vmatpush1.msra.mxu0 %v1695_v12  ;;  %v2530_v12 = vld [vmem:[#allocation14_spill] sm:$0xff]  ;;  %v2539_v44 = vld [vmem:[#allocation60_spill] sm:$0xff] }
  0xad   : > { %732 = vmatprep.subr.mxu1 %v1900_v42  ;;  %771 = vmatprep.subr.mxu0 %v1701_v14  ;;  %v2532_v14 = vld [vmem:[#allocation15_spill] sm:$0xff]  ;;  %v223_v34 = vshra.s32 %v216_v6, 4  ;;  %v225_v39 = vand.u32 15, %v216_v6  ;;  %v2537_v42 = vld [vmem:[#allocation58_spill] sm:$0xff] }
  0xae   : > { %733 = vmatpush2.msra.mxu1 %v1906_v63  ;;  %772 = vmatpush1.msra.mxu0 %v2523_v2  ;;  %v2548_v63 = vld [vmem:[#allocation24_spill] sm:$0xff]  ;;  %v2552_v0 = vld [vmem:[#allocation22_spill] sm:$0xff] }
  0xaf   : > { %734 = vmatprep.subr.mxu1 %v2524_v4  ;;  %773 = vmatprep.subr.mxu0 %v2526_v8  ;;  %v247_v47 = vcvt.s32.f32 %v223_v34  ;;  %v237_v52 = vcvt.s32.f32 %v225_v39  ;;  %v2551_v4 = vld [vmem:[#allocation26_spill] sm:$0xff]  ;;  %v2553_v6 = vcvt.s32.f32 %v2552_v0  ;;  %v2563_v39 = vld [vmem:[#allocation32_spill] sm:$0xff] }
  0xb0   : > { %735 = vmatpush2.msra.mxu1 %v2527_v27  ;;  %774 = vmatpush1.msra.mxu0 %v2528_v10  ;;  %v2554_v27 = vld [vmem:[#allocation27_spill] sm:$0xff]  ;;  %v2555_v10 = vld [vmem:[#allocation74_spill] sm:$0xff] }
  0xb1   : > { %736 = vmatprep.subr.mxu1 %v2529_v29  ;;  %775 = vmatprep.subr.mxu0 %v2530_v12  ;;  %v249_v26 = vadd.f32 %v1108_v50, %v247_v47  ;;  %v239_v2 = vadd.f32 %v1110_v59, %v237_v52  ;;  %v258_v8 = vadd.f32 %v2553_v6, %v227_v62  ;;  %v2556_v29 = vld [vmem:[#allocation28_spill] sm:$0xff]  ;;  %v2572_v47 = vld [vmem:[#allocation41_spill] sm:$0xff] }
  0xb2   : > { %737 = vmatpush2.msra.mxu1 %v2531_v30  ;;  %776 = vmatpush1.msra.mxu0 %v2532_v14  ;;  %v2557_v12 = vld [vmem:[#allocation76_spill] sm:$0xff]  ;;  %v2558_v14 = vld [vmem:[#allocation29_spill] sm:$0xff] }
  0xb3   : > { %738 = vmatprep.subr.mxu1 %v2533_v32  ;;  %777 = vmatprep.subr.mxu0 %v2534_v36  ;;  %v251_v30 = vmul.f32 0.13333334, %v249_v26  ;;  %v2559_v32 = vld [vmem:[#allocation30_spill] sm:$0xff]  ;;  %v260_v34 = vmul.f32 0.2857143, %v258_v8  ;;  %v2561_v36 = vld [vmem:[#allocation31_spill] sm:$0xff] }
  0xb4   : > { %739 = vmatpush2.msra.mxu1 %v2535_v38  ;;  %778 = vmatpush1.msra.mxu0 %v2536_v41  ;;  %v2562_v38 = vld [vmem:[#allocation81_spill] sm:$0xff]  ;;  %v2575_v50 = vld [vmem:[#allocation44_spill] sm:$0xff]  ;;  %v2595_v26 = vld [vmem:[#allocation82_spill] sm:$0xff] }
  0xb5   : > { %740 = vmatprep.subr.mxu1 %v2537_v42  ;;  %779 = vmatprep.subr.mxu0 %v2538_v43  ;;  %v2230_v41 = vadd.f32 -1.0, %v251_v30  ;;  %v2564_v42 = vld [vmem:[#allocation33_spill] sm:$0xff]  ;;  %v2565_v43 = vld [vmem:[#allocation34_spill] sm:$0xff]  ;;  %v2577_v52 = vld [vmem:[#allocation48_spill] sm:$0xff] }
  0xb6   : > { %741 = vmatpush2.msra.mxu1 %v2539_v44  ;;  %780 = vmatpush1.msra.mxu0 %v2540_v45  ;;  %v2238_v44 = vadd.f32 -1.0, %v260_v34  ;;  %v2566_v45 = vld [vmem:[#allocation35_spill] sm:$0xff]  ;;  %v2583_v59 = vld [vmem:[#allocation61_spill] sm:$0xff]  ;;  %v2589_v62 = vld [vmem:[#allocation72_spill] sm:$0xff] }
  0xb7   : > { %742 = vmatprep.subr.mxu1 %v2541_v46  ;;  %781 = vmatprep.subr.mxu0 %v2542_v48  ;;  %v2569_v46 = vld [vmem:[#allocation38_spill] sm:$0xff] }
  0xb8   : > { %743 = vmatpush2.msra.mxu1 %v2543_v49  ;;  %782 = vmatpush1.msra.mxu0 %v2544_v55  ;;  %v2573_v48 = vld [vmem:[#allocation42_spill] sm:$0xff]  ;;  %v2574_v49 = vld [vmem:[#allocation43_spill] sm:$0xff]  ;;  %v2579_v55 = vld [vmem:[#allocation53_spill] sm:$0xff] }
  0xb9   : > { %744 = vmatprep.subr.mxu1 %v2545_v58  ;;  %783 = vmatprep.subr.mxu0 %v2546_v60  ;;  %v2581_v58 = vld [vmem:[#allocation57_spill] sm:$0xff] }
  0xba   : > { %745 = vmatpush2.msra.mxu1 %v2547_v61  ;;  %784 = vmatpush1.msra.mxu0 %v2548_v63  ;;  %v2585_v60 = vld [vmem:[#allocation65_spill] sm:$0xff]  ;;  %v2591_v63 = vld [vmem:[#allocation75_spill] sm:$0xff] }
  0xbb   : > { %746 = vmatprep.subr.mxu1 %v2549_v57  ;;  %785 = vmatprep.subr.mxu0 %v2550_v54  ;;  %v2587_v61 = vld [vmem:[#allocation69_spill] sm:$0xff]  ;;  %v2593_v57 = vld [vmem:[#allocation78_spill] sm:$0xff] }
  0xbc   : > { %747 = vmatpush2.msra.mxu1 %v1996_v51  ;;  %786 = vmatpush1.msra.mxu0 %v2551_v4  ;;  %v241_v51 = vmul.f32 0.13333334, %v239_v2 }
  0xbd   : > { %748 = vmatprep.subr.mxu1 %v2003_v40  ;;  %787 = vmatprep.subr.mxu0 %v2554_v27  ;;  %v2560_v40 = vld [vmem:[#allocation79_spill] sm:$0xff] }
  0xbe   : > { %749 = vmatpush2.msra.mxu1 %v2555_v10  ;;  %788 = vmatpush1.msra.mxu0 %v2556_v29 }
  0xbf   : > { %750 = vmatprep.subr.mxu1 %v2557_v12  ;;  %789 = vmatprep.subr.mxu0 %v2558_v14 }
  0xc0   : > { %751 = vmatpush2.msra.mxu1 %v2021_v33  ;;  %790 = vmatpush1.msra.mxu0 %v2559_v32  ;;  %v2234_v33 = vadd.f32 -1.0, %v241_v51 }
  0xc1   : > { %752 = vmatprep.subr.mxu1 %v2560_v40  ;;  %791 = vmatprep.subr.mxu0 %v2561_v36 }
  0xc2   : > { %753 = vmatpush2.msra.mxu1 %v2562_v38  ;;  %792 = vmatpush1.msra.mxu0 %v2563_v39 }
  0xc3   : > { %754 = vmatprep.subr.mxu1 %v2039_v31  ;;  %793 = vmatprep.subr.mxu0 %v2564_v42  ;;  %v2567_v31 = vld [vmem:[#allocation36_spill] sm:$0xff] }
  0xc4   : > { %755 = vmatpush2.msra.mxu1 %v2045_v35  ;;  %794 = vmatpush1.msra.mxu0 %v2565_v43  ;;  %v2568_v35 = vld [vmem:[#allocation37_spill] sm:$0xff] }
  0xc5   : > { %756 = vmatprep.subr.mxu1 %v2051_v20  ;;  %795 = vmatprep.subr.mxu0 %v2566_v45  ;;  %v2570_v20 = vld [vmem:[#allocation39_spill] sm:$0xff] }
  0xc6   : > { %757 = vmatpush2.msra.mxu1 %v2057_v18  ;;  %758 = vmatprep.mubr.f32.mxu1 %v2230_v41  ;;  %v2571_v18 = vld [vmem:[#allocation40_spill] sm:$0xff] }
  0xc7   : > { %796 = vmatpush1.msra.mxu0 %v2567_v31  ;;  %829 = vmatprep.mubr.f32.mxu0 %v2522_v53 }
  0xc8   : > { %759 = vmatmul.mubr.f32.vlgmr.msra.gmra.mxu1 %v2234_v33  ;;  %830 = vmatmul.mubr.f32.vlgmr.msra.gmra.mxu0 %v2238_v44 }
  0xc9   : > { %1172 = vmatprep.subr.mxu0 %v2568_v35  ;;  %1259 = vmatprep.subr.mxu1 %v2522_v53 }
  0xca   : > { %1173 = vmatpush3.msra.mxu0 %v2569_v46  ;;  %1260 = vmatpush3.msra.mxu1 %v2068_v56  ;;  %v2576_v56 = vld [vmem:[#allocation46_spill] sm:$0xff] }
  0xcb   : > { %1174 = vmatprep.subr.mxu0 %v2570_v20  ;;  %1261 = vmatprep.subr.mxu1 %v2522_v53 }
  0xcc   : > { %1175 = vmatpush3.msra.mxu0 %v2571_v18  ;;  %1262 = vmatpush3.msra.mxu1 %v2072_v37  ;;  %v2578_v37 = vld [vmem:[#allocation50_spill] sm:$0xff] }
  0xcd   : > { %1176 = vmatprep.subr.mxu0 %v2572_v47  ;;  %1263 = vmatprep.subr.mxu1 %v2522_v53 }
  0xce   : > { %1177 = vmatpush3.msra.mxu0 %v2573_v48  ;;  %1264 = vmatpush3.msra.mxu1 %v2077_v24  ;;  %v2580_v24 = vld [vmem:[#allocation55_spill] sm:$0xff] }
  0xcf   : > { %1178 = vmatprep.subr.mxu0 %v2574_v49  ;;  %1265 = vmatprep.subr.mxu1 %v2522_v53 }
  0xd0   : > { %1179 = vmatpush3.msra.mxu0 %v2575_v50  ;;  %1266 = vmatpush3.msra.mxu1 %v2083_v1  ;;  %v2582_v1 = vld [vmem:[#allocation59_spill] sm:$0xff] }
  0xd1   : > { %1180 = vmatprep.subr.mxu0 %v2576_v56  ;;  %1267 = vmatprep.subr.mxu1 %v2522_v53 }
  0xd2   : > { %1181 = vmatpush3.msra.mxu0 %v2577_v52  ;;  %1268 = vmatpush3.msra.mxu1 %v2089_v3  ;;  %v2584_v3 = vld [vmem:[#allocation63_spill] sm:$0xff] }
  0xd3   : > { %1182 = vmatprep.subr.mxu0 %v2578_v37  ;;  %1269 = vmatprep.subr.mxu1 %v2522_v53 }
  0xd4   : > { %1183 = vmatpush3.msra.mxu0 %v2579_v55  ;;  %1270 = vmatpush3.msra.mxu1 %v2095_v5  ;;  %v2586_v5 = vld [vmem:[#allocation67_spill] sm:$0xff] }
  0xd5   : > { %1184 = vmatprep.subr.mxu0 %v2580_v24  ;;  %1271 = vmatprep.subr.mxu1 %v2522_v53 }
  0xd6   : > { %1185 = vmatpush3.msra.mxu0 %v2581_v58  ;;  %1272 = vmatpush3.msra.mxu1 %v2101_v7  ;;  %v2588_v7 = vld [vmem:[#allocation71_spill] sm:$0xff] }
  0xd7   : > { %1186 = vmatprep.subr.mxu0 %v2582_v1  ;;  %1273 = vmatprep.subr.mxu1 %v2522_v53 }
  0xd8   : > { %1187 = vmatpush3.msra.mxu0 %v2583_v59  ;;  %1274 = vmatpush3.msra.mxu1 %v2107_v9  ;;  %v2590_v9 = vld [vmem:[#allocation73_spill] sm:$0xff] }
  0xd9   : > { %1188 = vmatprep.subr.mxu0 %v2584_v3  ;;  %1275 = vmatprep.subr.mxu1 %v2522_v53 }
  0xda   : > { %1189 = vmatpush3.msra.mxu0 %v2585_v60  ;;  %1276 = vmatpush3.msra.mxu1 %v2113_v11  ;;  %v2592_v11 = vld [vmem:[#allocation77_spill] sm:$0xff] }
  0xdb   : > { %1190 = vmatprep.subr.mxu0 %v2586_v5  ;;  %1277 = vmatprep.subr.mxu1 %v2522_v53 }
  0xdc   : > { %1191 = vmatpush3.msra.mxu0 %v2587_v61  ;;  %1278 = vmatpush3.msra.mxu1 %v2119_v13  ;;  %v2594_v13 = vld [vmem:[#allocation80_spill] sm:$0xff] }
  0xdd   : > { %1192 = vmatprep.subr.mxu0 %v2588_v7  ;;  %1279 = vmatprep.subr.mxu1 %v2522_v53 }
  0xde   : > { %1193 = vmatpush3.msra.mxu0 %v2589_v62  ;;  %1280 = vmatpush3.msra.mxu1 %v2125_v15  ;;  %v2596_v15 = vld [vmem:[#allocation83_spill] sm:$0xff] }
  0xdf   : > { %1194 = vmatprep.subr.mxu0 %v2590_v9  ;;  %1281 = vmatprep.subr.mxu1 %v2522_v53 }
  0xe0   : > { %1195 = vmatpush3.msra.mxu0 %v2591_v63  ;;  %1282 = vmatpush3.msra.mxu1 %v2131_v17 }
  0xe1   : > { %1196 = vmatprep.subr.mxu0 %v2592_v11  ;;  %1283 = vmatprep.subr.mxu1 %v2522_v53 }
  0xe2   : > { %1197 = vmatpush3.msra.mxu0 %v2593_v57  ;;  %1284 = vmatpush3.msra.mxu1 %v2137_v19 }
  0xe3   : > { %1198 = vmatprep.subr.mxu0 %v2594_v13  ;;  %1285 = vmatprep.subr.mxu1 %v2522_v53 }
  0xe4   : > { %1199 = vmatpush3.msra.mxu0 %v2595_v26  ;;  %1286 = vmatpush3.msra.mxu1 %v2143_v21 }
  0xe5   : > { %1200 = vmatprep.subr.mxu0 %v2043_v28  ;;  %1287 = vmatprep.subr.mxu1 %v2522_v53 }
  0xe6   : > { %1201 = vmatpush3.msra.mxu0 %v2049_v22  ;;  %900 = vmatprep.mubr.f32.mxu0 %v2230_v41 }
  0xe7   : > { %1202 = vmatprep.subr.mxu0 %v2596_v15  ;;  %1288 = vmatpush3.msra.mxu1 %v2149_v23 }
  0xe8   : > { %1203 = vmatpush3.msra.mxu0 %v2061_v16  ;;  %1289 = vmatprep.subr.mxu1 %v2522_v53 }
  0xe9   : > { %901 = vmatmul.mubr.f32.vlgmr.msra.gmra.mxu0 %v2234_v33  ;;  %1290 = vmatpush3.msra.mxu1 %v2155_v25 }
  0xea   : > { %1291 = vmatprep.mubr.msk.f32.mxu1 %vm1524_vm0, %v2522_v53 }
  0xeb   : > { %1292 = vmatmul.mubr.f32.vlgmr.msra.gmra.mxu1 %v2238_v44 }
 0x125   : > { %v546_v28 = vpop.f32.mrf.mxu1 }
 0x127   : > { %v548_v19 = vpop.f32.mrf.mxu1 }
 0x144   : > { %v475_v22 = vpop.f32.mrf.mxu0 }
 0x145   : > { %v547_v17 = vadd.f32 %v546_v28, %v475_v22 }
 0x146   : > { %v477_v21 = vpop.f32.mrf.mxu0  ;;  %v1152_v23 = vpop.f32.mrf.mxu1 }
 0x147   : > { %691 = vst [vmem:[%s207_s17] sm:$0xff] %v547_v17  ;;  %v549_v16 = vadd.f32 %v548_v19, %v477_v21 }
 0x148   : > { %v1153_v54 = vpop.f32.mrf.mxu1 }
 0x149   : > { %692 = vst [vmem:[%s207_s17 + $0x8] sm:$0xff] %v549_v16  ;;  %v1154_v2 = vadd.f32 %v1153_v54, %v1152_v23 }
 0x166   : > { %v687_v25 = vpop.f32.mrf.mxu0 }
 0x167   : > { %v688_v4 = vadd.f32 %v1154_v2, %v687_v25 }
 0x168   : > { %v1258_v0 = vpop.f32.mrf.mxu0 }
 0x169   : > { %693 = vst [vmem:[%s207_s17 + $0x10] sm:$0xff] %v688_v4 }
 0x188   : > { %v760_v53 = vpop.f32.mrf.mxu1  ;;  %v831_v6 = vpop.f32.mrf.mxu0 }
 0x189   : > { %v832_v8 = vadd.f32 %v831_v6, %v760_v53 }
 0x18a   : > { %v762_v27 = vpop.f32.mrf.mxu1  ;;  %v833_v10 = vpop.f32.mrf.mxu0 }
 0x18b   : > { %976 = vst [vmem:[%s207_s17 + $0x18] sm:$0xff] %v832_v8  ;;  %v834_v29 = vadd.f32 %v833_v10, %v762_v27 }
 0x18d   : > { %977 = vst [vmem:[%s207_s17 + $0x20] sm:$0xff] %v834_v29 }
 0x1a9   : > { %v1204_v12 = vpop.f32.mrf.mxu0 }
 0x1ab   : > { %v1205_v30 = vpop.f32.mrf.mxu0  ;;  %v972_v14 = vpop.f32.mrf.mxu1 }
 0x1ac   : > { %v1206_v51 = vadd.f32 %v1205_v30, %v1204_v12 }
 0x1ad   : > { %v1293_v32 = vpop.f32.mrf.mxu1 }
 0x1ae   : > { %v973_v40 = vadd.f32 %v1206_v51, %v972_v14 }
 0x1b0   : > { %978 = vst [vmem:[%s207_s17 + $0x28] sm:$0xff] %v973_v40 }
 0x1b1   : > { %1444 = shalt.err (!%p1441_p6)
}
 0x1b2   : > { %s1445_s30 = scalar_lea.hbm %s996_s18, 768  ;;  %s1449_s7 = scalar_lea.hbm %s2360_s2, 1536 }
 0x1b3   : > { %p1446_p4 = scmp.ne.s32.totalorder %s996_s18, %s1445_s30  ;;  %p1450_p0 = scmp.lt.s32.totalorder %s996_s18, %s2360_s2 }
 0x1b4   : > { %p1451_p3 = scmp.lt.s32.totalorder %s1449_s7, %s1445_s30 }
 0x1b5   : > { %p1447_p9 = pnand %p1446_p4, %p1624_p13 }
 0x1b6   : > { %p1452_p1 = por %p1451_p3, %p1450_p0 }
 0x1b7   : > { %p1448_p12 = pneg %p1447_p9 }
 0x1b9   : > { %p1453_p8 = pnand %p1452_p1, %p1448_p12 }
 0x1bb   : > { %1456 = shalt.err (!%p1453_p8)
}
 0x1bc   : > { %1304 = dma.vmem_to_hbm [thread:$0]  (%p1624_p13), %s999_s21, 768, %s996_s18, %s980_s26  }
 0x1bd PF: > { %s1010_s16 = sand.u32 1, %s1495_s9   ;;  %p2597_p11 = scmp.ne.s32.totalorder %s2442_s20, 0 }
 0x1be   : > { %s1011_s24 = scalar_lea.sflag [#allocation4], %s1010_s16 }
 0x1bf   : > { %p1315_p2 = pnand %p1103_p10, %p2597_p11 }
 0x1c1   : > { %p1316_p5 = pneg %p1315_p2 }
 0x1c3   : > { %1490 = dma.done.wait (%p1316_p5), %s1011_s24, 768  }
 0x1c4   : > { %1492 = vsyncadd (%p1316_p5), %s1011_s24, 4294966528  ;;  %s19_s14 = sadd.s32 1, %s1515_s14   ;;  %s2598_s9 = smov %s1499_s10 }
 0x1c5   : > { %p16_p7 = scmp.ge.s32.totalorder %s19_s14, 4   ;;  %s2599_s10 = smov %s1503_s11 }
 0x1c6   : > { %s2600_s11 = smov %s1633_s8  ;;  %s2601_s12 = smov %s1511_s13 }
 0x1c7   : > { %s2602_s13 = smov %s2604_s25  ;;  %18 = sbr.rel (!%p16_p7) target bundleno = 7 (0x7), region = 79 }
 0x1cc   :  { %1016 = vsyncpa [#allocation3], 1 }
 0x1cd   :  { %1018 = vsyncpa [#allocation3 + $0x1], 1 }
 0x1ce   :  { %1019 = vsyncpa [#allocation6], 1 }
 0x1cf   :  { %1020 = vsyncpa [#allocation4], 1 }
 0x1d0   :  { %1022 = vsyncpa [#allocation4 + $0x1], 1 }

</bundles_post_ra>
